<compile_context>
chip_gen: v6e
topology: v6e:2x2x1
jax: 0.10.0
libtpu: 0.0.40
codegen_flags: <defaults>
</compile_context>

<pallas_src>
import jax
import jax.numpy as jnp
from jax.experimental import pallas as pl
from jax.experimental.pallas import tpu as pltpu

HIDDEN = 128


def _round_up(x, m):
    return ((x + m - 1) // m) * m


def _pick_tiling(batch, tile_b):
    """Best-effort tiling: >=2 grid steps (v7x has 2 TCs behind the "parallel"
    axis), an even step count when possible, tile_b a multiple of 256."""
    n = max(2, pl.cdiv(batch, tile_b))
    if n % 2:
        n += 1
    tb = min(tile_b, max(256, _round_up(pl.cdiv(batch, n), 256)))
    return tb, pl.cdiv(batch, tb)


def _make_qnet_kernel(compute_dtype):
    def kernel(s_ref, a_ref, w1_ref, b1_ref, w2_ref, b2_ref, w3_ref, b3_ref,
               out_ref):
        # Fused concat along the lane axis (XLU shift/select; widths 8 and 4
        # are sub-128 so this is a masked in-tile merge).
        x = jnp.concatenate([s_ref[...], a_ref[...]], axis=-1)
        x = x.astype(compute_dtype)

        # Layer 1: single [tile_b, s+a] x [s+a, 128] MXU dot, f32 accumulate.
        h1 = jnp.dot(x, w1_ref[...].astype(compute_dtype),
                     preferred_element_type=jnp.float32)
        h1 = jnp.maximum(h1 + b1_ref[...], 0.0)

        # Layer 2: [tile_b, 128] x [128, 128] MXU dot, f32 accumulate.
        h2 = jnp.dot(h1.astype(compute_dtype),
                     w2_ref[...].astype(compute_dtype),
                     preferred_element_type=jnp.float32)
        h2 = jnp.maximum(h2 + b2_ref[...], 0.0)

        # Layer 3 (128 -> 1) as w3 @ h2^T: M=1 so the MXU cost is negligible
        # and the result is already lane-dense (1, tile_b) — no transpose and
        # no 1-lane-wide masked output stores.
        q = jnp.einsum("oh,bh->ob", w3_ref[...].astype(jnp.float32), h2,
                       preferred_element_type=jnp.float32)
        q = q + b3_ref[0, 0]                      # scalar bias from SMEM

        out_ref[...] = q.reshape(out_ref.shape).astype(out_ref.dtype)

    return kernel


def q_net_forward(s, a, params, *, tile_b=1024, small_batch_threshold=1024,
                  compute_dtype=jnp.bfloat16):
    """Q(s, a) via a single fused Pallas kernel.

    Small batches (<= small_batch_threshold): one grid-less block, everything
    VMEM-resident.  Larger batches: batch-tiled grid, weights resident,
    activation tiles double-buffered, parallel across TensorCores.
    """
    w1, b1, w2, b2, w3, b3 = params
    B, state_dim = s.shape
    action_dim = a.shape[1]
    kernel = _make_qnet_kernel(compute_dtype)

    smem = pl.BlockSpec(memory_space=pltpu.MemorySpace.SMEM)

    if B <= small_batch_threshold:
        vmem = pl.BlockSpec(memory_space=pltpu.MemorySpace.VMEM)
        out = pl.pallas_call(
            kernel,
            out_shape=jax.ShapeDtypeStruct((1, 1, B), jnp.float32),
            in_specs=[vmem, vmem, vmem, vmem, vmem, vmem, vmem, smem],
            out_specs=vmem,
        )(s, a, w1, b1, w2, b2, w3, b3)
        return out.reshape(B, 1)

    # --- batch-tiled, pipelined path -------------------------------------
    tb, num_tiles = _pick_tiling(B, tile_b)
    batch_tile = lambda i: (i, 0)   # walk down the batch axis
    resident = lambda i: (0, 0)     # weights/biases stay put across grid steps

    out = pl.pallas_call(
        kernel,
        out_shape=jax.ShapeDtypeStruct((num_tiles, 1, tb), jnp.float32),
        grid=(num_tiles,),
        in_specs=[
            pl.BlockSpec((tb, state_dim), batch_tile),
            pl.BlockSpec((tb, action_dim), batch_tile),
            pl.BlockSpec((state_dim + action_dim, HIDDEN), resident),
            pl.BlockSpec((1, HIDDEN), resident),
            pl.BlockSpec((HIDDEN, HIDDEN), resident),
            pl.BlockSpec((1, HIDDEN), resident),
            pl.BlockSpec((1, HIDDEN), resident),
            smem,
        ],
        out_specs=pl.BlockSpec((1, 1, tb), lambda i: (i, 0, 0)),
        compiler_params=pltpu.CompilerParams(
            dimension_semantics=("parallel",),
        ),
    )(s, a, w1, b1, w2, b2, w3, b3)

    # Lane-dense slab -> (B, 1).  Rows >= B of the last (partial) tile are
    # unspecified partial-block data and are dropped here (output is tiny, so
    # this slice is negligible — unlike padding the full input stream).
    return out.reshape(num_tiles * tb)[:B].reshape(B, 1)


def init_params(key, state_dim, action_dim, hidden=HIDDEN,
                dtype=jnp.bfloat16):
    """PyTorch-style (Kaiming-uniform-ish) init.

    Returns (w1, b1, w2, b2, w3_row, b3): weights transposed to [in, out]
    (stored in `dtype`, bf16 by default for the MXU), last-layer weight as a
    (1, hidden) row, b1/b2 as [1, hidden] f32, b3 as (1, 1) f32 (SMEM scalar).
    """
    keys = jax.random.split(key, 6)
    in1 = state_dim + action_dim
    bnd1 = 1.0 / (in1 ** 0.5)
    bnd2 = 1.0 / (hidden ** 0.5)

    w1 = jax.random.uniform(keys[0], (in1, hidden), jnp.float32, -bnd1, bnd1)
    b1 = jax.random.uniform(keys[1], (1, hidden), jnp.float32, -bnd1, bnd1)
    w2 = jax.random.uniform(keys[2], (hidden, hidden), jnp.float32, -bnd2, bnd2)
    b2 = jax.random.uniform(keys[3], (1, hidden), jnp.float32, -bnd2, bnd2)
    w3 = jax.random.uniform(keys[4], (1, hidden), jnp.float32, -bnd2, bnd2)
    b3 = jax.random.uniform(keys[5], (1, 1), jnp.float32, -bnd2, bnd2)

    cast = lambda w: w.astype(dtype)
    return (cast(w1), b1, cast(w2), b2, cast(w3), b3)


def q_net_reference(s, a, params, compute_dtype=jnp.bfloat16):
    """Pure-JAX reference with the same mixed-precision policy as the kernel
    (bf16 matmul operands, f32 accumulation / biases / ReLU / final dot)."""
    w1, b1, w2, b2, w3, b3 = params
    cd = compute_dtype
    x = jnp.concatenate([s, a], axis=1).astype(cd)
    h1 = jnp.dot(x, w1.astype(cd), preferred_element_type=jnp.float32) + b1
    h1 = jnp.maximum(h1, 0.0)
    h2 = jnp.dot(h1.astype(cd), w2.astype(cd),
                 preferred_element_type=jnp.float32) + b2
    h2 = jnp.maximum(h2, 0.0)
    return jnp.dot(h2, w3.astype(jnp.float32).T,
                   preferred_element_type=jnp.float32) + b3


if __name__ == "__main__":
    state_dim, action_dim = 8, 4

    key = jax.random.PRNGKey(0)
    k_p, k1, k2, k3, k4 = jax.random.split(key, 5)
    params = init_params(k_p, state_dim, action_dim)

    # --- tiny batch: grid-less single-block path --------------------------
    s_small = jax.random.normal(k1, (2, state_dim), jnp.float32)
    a_small = jax.random.normal(k2, (2, action_dim), jnp.float32)
    out_small = jax.block_until_ready(q_net_forward(s_small, a_small, params))
    ref_small = q_net_reference(s_small, a_small, params)
    assert out_small.shape == (2, 1), out_small.shape
    assert jnp.allclose(out_small, ref_small, atol=1e-2, rtol=1e-2), (
        out_small, ref_small)

    # --- larger batch: batch-tiled, pipelined path (ragged last tile) -----
    B = 640
    s_big = jax.random.normal(k3, (B, state_dim), jnp.float32)
    a_big = jax.random.normal(k4, (B, action_dim), jnp.float32)
    out_big = jax.block_until_ready(
        q_net_forward(s_big, a_big, params, tile_b=256,
                      small_batch_threshold=128))
    ref_big = q_net_reference(s_big, a_big, params)
    assert out_big.shape == (B, 1), out_big.shape
    assert jnp.allclose(out_big, ref_big, atol=1e-2, rtol=1e-2)

    print("KERNEL_OK")
</pallas_src>

<mosaic_0001>
module attributes {stable_mosaic.version = 11 : i64} {
  func.func @kernel(%arg0: memref<2x8xf32, #tpu.memory_space<vmem>>, %arg1: memref<2x4xf32, #tpu.memory_space<vmem>>, %arg2: memref<12x128xbf16, #tpu.memory_space<vmem>>, %arg3: memref<1x128xf32, #tpu.memory_space<vmem>>, %arg4: memref<128x128xbf16, #tpu.memory_space<vmem>>, %arg5: memref<1x128xf32, #tpu.memory_space<vmem>>, %arg6: memref<1x128xbf16, #tpu.memory_space<vmem>>, %arg7: memref<1x1xf32, #tpu.memory_space<smem>>, %arg8: memref<1x1x2xf32, #tpu.memory_space<vmem>>) attributes {dimension_semantics = [], scalar_prefetch = 0 : i64, scratch_operands = 0 : i64, tpu.core_type = #tpu.core_type<tc>} {
    %c0 = arith.constant 0 : index
    %c0_0 = arith.constant 0 : index
    %0 = vector.load %arg0[%c0, %c0_0] : memref<2x8xf32, #tpu.memory_space<vmem>>, vector<2x8xf32>
    %c0_1 = arith.constant 0 : index
    %c0_2 = arith.constant 0 : index
    %1 = vector.load %arg1[%c0_1, %c0_2] : memref<2x4xf32, #tpu.memory_space<vmem>>, vector<2x4xf32>
    %2 = tpu.concatenate %0, %1 in 1 : vector<2x8xf32>, vector<2x4xf32> -> vector<2x12xf32>
    %3 = arith.truncf %2 : vector<2x12xf32> to vector<2x12xbf16>
    %c0_3 = arith.constant 0 : index
    %c0_4 = arith.constant 0 : index
    %4 = vector.load %arg2[%c0_3, %c0_4] : memref<12x128xbf16, #tpu.memory_space<vmem>>, vector<12x128xbf16>
    %cst = arith.constant dense<0.000000e+00> : vector<2x128xf32>
    %5 = tpu.matmul %3, %4, %cst {dimension_numbers = #tpu.dot_dimension_numbers<[1], [0], [0], [1], [0, 0, 1, 1], [], []>} : vector<2x12xbf16>, vector<12x128xbf16>, vector<2x128xf32> -> vector<2x128xf32>
    %c0_5 = arith.constant 0 : index
    %c0_6 = arith.constant 0 : index
    %6 = vector.load %arg3[%c0_5, %c0_6] : memref<1x128xf32, #tpu.memory_space<vmem>>, vector<1x128xf32>
    %7 = vector.broadcast %6 : vector<1x128xf32> to vector<2x128xf32>
    %8 = arith.addf %5, %7 : vector<2x128xf32>
    %cst_7 = arith.constant 0.000000e+00 : f32
    %9 = vector.broadcast %cst_7 : f32 to vector<2x128xf32>
    %10 = arith.maximumf %8, %9 : vector<2x128xf32>
    %11 = arith.truncf %10 : vector<2x128xf32> to vector<2x128xbf16>
    %c0_8 = arith.constant 0 : index
    %c0_9 = arith.constant 0 : index
    %12 = vector.load %arg4[%c0_8, %c0_9] : memref<128x128xbf16, #tpu.memory_space<vmem>>, vector<128x128xbf16>
    %cst_10 = arith.constant dense<0.000000e+00> : vector<2x128xf32>
    %13 = tpu.matmul %11, %12, %cst_10 {dimension_numbers = #tpu.dot_dimension_numbers<[1], [0], [0], [1], [0, 0, 1, 1], [], []>} : vector<2x128xbf16>, vector<128x128xbf16>, vector<2x128xf32> -> vector<2x128xf32>
    %c0_11 = arith.constant 0 : index
    %c0_12 = arith.constant 0 : index
    %14 = vector.load %arg5[%c0_11, %c0_12] : memref<1x128xf32, #tpu.memory_space<vmem>>, vector<1x128xf32>
    %15 = vector.broadcast %14 : vector<1x128xf32> to vector<2x128xf32>
    %16 = arith.addf %13, %15 : vector<2x128xf32>
    %cst_13 = arith.constant 0.000000e+00 : f32
    %17 = vector.broadcast %cst_13 : f32 to vector<2x128xf32>
    %18 = arith.maximumf %16, %17 : vector<2x128xf32>
    %c0_14 = arith.constant 0 : index
    %c0_15 = arith.constant 0 : index
    %19 = vector.load %arg6[%c0_14, %c0_15] : memref<1x128xbf16, #tpu.memory_space<vmem>>, vector<1x128xbf16>
    %20 = arith.extf %19 : vector<1x128xbf16> to vector<1x128xf32>
    "tpu.trace_start"() <{level = 10 : i32, message = "oh,bh->ob"}> : () -> ()
    %cst_16 = arith.constant dense<0.000000e+00> : vector<1x2xf32>
    %21 = tpu.matmul %20, %18, %cst_16 {dimension_numbers = #tpu.dot_dimension_numbers<[1], [1], [0], [0], [0, 0, 1, 0], [], []>} : vector<1x128xf32>, vector<2x128xf32>, vector<1x2xf32> -> vector<1x2xf32>
    "tpu.trace_stop"() : () -> ()
    %c0_17 = arith.constant 0 : index
    %c0_18 = arith.constant 0 : index
    %22 = memref.load %arg7[%c0_17, %c0_18] : memref<1x1xf32, #tpu.memory_space<smem>>
    %23 = vector.broadcast %22 : f32 to vector<1x2xf32>
    %24 = arith.addf %21, %23 : vector<1x2xf32>
    %25 = vector.shape_cast %24 : vector<1x2xf32> to vector<1x1x2xf32>
    %c0_19 = arith.constant 0 : index
    %c0_20 = arith.constant 0 : index
    %c0_21 = arith.constant 0 : index
    %26 = vector.load %arg8[%c0_19, %c0_20, %c0_21] : memref<1x1x2xf32, #tpu.memory_space<vmem>>, vector<1x1x2xf32>
    tpu.vector_store %arg8[%c0_19, %c0_20, %c0_21], %25 {strides = array<i32>} : memref<1x1x2xf32, #tpu.memory_space<vmem>>, vector<1x1x2xf32>,
    return
  }
}

</mosaic_0001>

<bundles_post_ra>
// kernel: tpu_custom_call.1
= control target key start
LH: loop header
LB: loop body
LE: loop exit
PB: predicated region body
PF: predicated region fallthrough
CT: control target
= control target key end

     0   :  { %14 = vsyncpa [#allocation4], 0  ;;  %s592_s0 = inlined_call_operand.vmem [shape: f32[2,8], index: 0, kind: input, shape index: {}]   ;;  %s593_s1 = inlined_call_operand.hbm [shape: f32[2,4], index: 1, kind: input, shape index: {}]   ;;  %s594_s2 = inlined_call_operand.hbm [shape: bf16[12,128], index: 2, kind: input, shape index: {}]   ;;  %s595_s3 = inlined_call_operand.vmem [shape: f32[1,128], index: 3, kind: input, shape index: {}]   ;;  %s596_s4 = inlined_call_operand.hbm [shape: bf16[128,128], index: 4, kind: input, shape index: {}]   ;;  %s597_s5 = inlined_call_operand.vmem [shape: f32[1,128], index: 5, kind: input, shape index: {}]   ;;  %s598_s6 = inlined_call_operand.vmem [shape: bf16[1,128], index: 6, kind: input, shape index: {}]   ;;  %s599_s7 = inlined_call_operand.<no memory space> [shape: f32[1,1], index: 7, kind: input, shape index: {}]   ;;  %s600_s8 = inlined_call_operand.hbm [shape: f32[1,1,2], index: 8, kind: output, shape index: {}]  }
   0x1   :  { %15 = vsyncpa [#allocation7], 0 }
   0x2   :  { %16 = vsyncpa [#allocation5], 0  ;;  %s508_s27 = smov [#allocation6]  }
   0x3   :  { %s34_s28 = sshll.u32 %s508_s27, 4  ;;  %s35_s28 = int_to_ptr.vmem [resolvable:$true] %s34_s28 }
   0x4   :  { %s430_s29 = scalar_lea.vmem %s35_s28, 128  ;;  %p435_p1 = scmp.lt.s32.totalorder %s35_s28, %s35_s28 }
   0x5   :  { %p431_p0 = scmp.ne.s32.totalorder %s35_s28, %s430_s29  ;;  %p436_p2 = scmp.lt.s32.totalorder %s430_s29, %s430_s29 }
   0x7   :  { %p437_p3 = por %p436_p2, %p435_p1 }
   0x9   :  { %p438_p4 = pnand %p437_p3, %p431_p0 }
   0xb   :  { %441 = shalt.err (!%p438_p4)
}
   0xc   :  { %s509_s30 = smov 64   ;;  %s510_s9 = smov 4  }
   0xd   :  { %40 = dma.hbm_to_vmem [thread:$0]  %s594_s2, 128, %s35_s28, [#allocation7], %s509_s30, %s509_s30, %s510_s9  }
   0xe   :  { %s511_s12 = smov [#allocation3]   ;;  %s512_s14 = smov [#allocation8]  }
   0xf   :  { %s25_s13 = sshll.u32 %s511_s12, 4  ;;  %s48_s15 = sshll.u32 %s512_s14, 4  ;;  %s26_s13 = int_to_ptr.vmem [resolvable:$true] %s25_s13  ;;  %s49_s15 = int_to_ptr.vmem [resolvable:$true] %s48_s15 }
  0x10   :  { %s450_s16 = scalar_lea.vmem %s26_s13, 32  ;;  %p455_p6 = scmp.lt.s32.totalorder %s26_s13, %s26_s13 }
  0x11   :  { %p451_p5 = scmp.ne.s32.totalorder %s26_s13, %s450_s16  ;;  %p456_p7 = scmp.lt.s32.totalorder %s450_s16, %s450_s16 }
  0x13   :  { %p457_p8 = por %p456_p7, %p455_p6 }
  0x15   :  { %p458_p9 = pnand %p457_p8, %p451_p5 }
  0x17   :  { %461 = shalt.err (!%p458_p9)
}
  0x18   :  { %28 = dma.hbm_to_vmem [thread:$0]  %s593_s1, 32, %s26_s13, [#allocation4]  }
  0x19   :  { %s470_s19 = scalar_lea.vmem %s49_s15, 1024  ;;  %p475_p11 = scmp.lt.s32.totalorder %s49_s15, %s49_s15 }
  0x1a   :  { %p471_p10 = scmp.ne.s32.totalorder %s49_s15, %s470_s19  ;;  %p476_p12 = scmp.lt.s32.totalorder %s470_s19, %s470_s19 }
  0x1c   :  { %p477_p13 = por %p476_p12, %p475_p11 }
  0x1e   :  { %p478_p0 = pnand %p477_p13, %p471_p10 }
  0x20   :  { %481 = shalt.err (!%p478_p0)
}
  0x21   :  { %54 = dma.hbm_to_vmem [thread:$0]  %s596_s4, 1024, %s49_s15, [#allocation7], %s509_s30, %s509_s30, %s510_s9  }
  0x22   :  { %502 = dma.done.wait [#allocation4], 32  }
  0x23   :  { %503 = vsyncadd [#allocation4], 4294967264 }
  0x24   :  { %504 = dma.done.wait [#allocation7], 1152  }
  0x25   :  { %505 = vsyncadd [#allocation7], 4294966144  ;;  %v513_v0 = vmov 0.0   ;;  %vm514_vm0 = vmmov 0   ;;  %v72_v1 = vld [vmem:[#allocation3] sm:$0x3]  ;;  %v259_v33 = vstv %s599_s7 }
  0x26   :  { %373 = vmatprep.subr.bf16.mxu0 %v513_v0  ;;  %379 = vmatprep.subr.bf16.mxu1 %v513_v0  ;;  %vm98_vm1 = vcmask 1045504   ;;  %s515_s1 = smov 8   ;;  %v413_v2 = vld [vmem:[#allocation6] sm:$0x3f]   ;;  %v415_v5 = vld [vmem:[#allocation8 + $0x30] sm:$0xff]   ;;  %v416_v6 = vld [vmem:[#allocation8 + $0x28] sm:$0xff]  }
  0x27   :  { %375 = vmatprep.mubr.msk.bf16.mxu0 %vm514_vm0, %v513_v0  ;;  %395 = vmatprep.mubr.msk.bf16.mxu1 %vm514_vm0, %v513_v0  ;;  %v414_v3 = vld [vmem:[#allocation8 + $0x38] sm:$0xff]   ;;  %v100_v4 = vsel %vm98_vm1, %v413_v2, 0  ;;  %v417_v7 = vld [vmem:[#allocation8 + $0x20] sm:$0xff]   ;;  %v419_v9 = vld [vmem:[#allocation8 + $0x10] sm:$0xff]   ;;  %vm77_vm2 = vcmask 64512   ;;  %vm94_vm3 = vcmask 97280  }
  0x28   :  { %74 = vrot.lane.b32.xlu0 %v72_v1, %s515_s1  ;;  %374 = vmatpush3.bf16.msra.mxu0 %v100_v4  ;;  %v418_v8 = vld [vmem:[#allocation8 + $0x18] sm:$0xff]   ;;  %v71_v10 = vld [vmem:[%s592_s0] sm:$0x3]  ;;  %v420_v14 = vld [vmem:[#allocation8 + $0x8] sm:$0xff]   ;;  %s516_s28 = smov [#allocation9]   ;;  %vm330_vm4 = vcmask 8192  }
  0x29   :  { %380 = vmatpush3.bf16.msra.mxu1 %v414_v3  ;;  %399 = vmatprep.subr.mxu0 %v513_v0  ;;  %v421_v15 = vld [vmem:[#allocation8] sm:$0xff]   ;;  %v348_v16 = vld [vmem:[%s595_s3] ss:$0 sm:$0xff]  ;;  %s338_s29 = sshll.u32 %s516_s28, 4  ;;  %s339_s29 = int_to_ptr.vmem [resolvable:$true] %s338_s29 }
  0x2a   :  { %381 = vmatprep.subr.bf16.mxu1 %v513_v0  ;;  %v351_v24 = vld [vmem:[%s597_s5] ss:$0 sm:$0xff]  ;;  %s482_s5 = scalar_lea.vmem %s339_s29, 16  ;;  %p487_p2 = scmp.lt.s32.totalorder %s339_s29, %s339_s29 }
  0x2b   :  { %v256_v27 = vld [vmem:[%s598_s6] sm:$0x1]  ;;  %p483_p1 = scmp.ne.s32.totalorder %s339_s29, %s482_s5  ;;  %s486_s6 = scalar_lea.vmem %s339_s29, 32 }
  0x2c   :  { %v257_v31 = vunpack.c.l.bf16 %v256_v27  ;;  %p488_p3 = scmp.lt.s32.totalorder %s486_s6, %s482_s5 }
  0x2d   :  { %382 = vmatpush3.bf16.msra.mxu1 %v415_v5 }
  0x2e   :  { %383 = vmatprep.subr.bf16.mxu1 %v513_v0  ;;  %p489_p4 = por %p488_p3, %p487_p2 }
  0x30   :  { %p490_p5 = pnand %p489_p4, %p483_p1 }
  0x31   :  { %384 = vmatpush3.bf16.msra.mxu1 %v416_v6 }
  0x32   :  { %385 = vmatprep.subr.bf16.mxu1 %v513_v0 }
  0x35   :  { %386 = vmatpush3.bf16.msra.mxu1 %v417_v7 }
  0x36   :  { %387 = vmatprep.subr.bf16.mxu1 %v513_v0 }
  0x39   :  { %388 = vmatpush3.bf16.msra.mxu1 %v418_v8 }
  0x3a   :  { %389 = vmatprep.subr.bf16.mxu1 %v513_v0 }
  0x3d   :  { %390 = vmatpush3.bf16.msra.mxu1 %v419_v9 }
  0x3e   :  { %391 = vmatprep.subr.bf16.mxu1 %v513_v0 }
  0x41   :  { %392 = vmatpush3.bf16.msra.mxu1 %v420_v14 }
  0x42   :  { %393 = vmatprep.subr.bf16.mxu1 %v513_v0 }
  0x45   :  { %394 = vmatpush3.bf16.msra.mxu1 %v421_v15 }
  0x9a   :  { %v75_v11 = vpop.permute.xlu0 %74 }
  0x9b   :  { %v78_v12 = vsel %vm77_vm2, %v71_v10, %v75_v11 }
  0x9c   :  { %v79_v13 = vpack.c.bf16 %v78_v12, %v78_v12 }
  0x9e   :  { %376 = vmatmul.mubr.msk.bf16.vlgmr.msra.gmra.mxu0 %vm94_vm3, %v79_v13 }
  0x9f   :  { %401 = vmatprep.mubr.msk.f32.mxu0 %vm514_vm0, %v513_v0 }
 0x15e   :  { %v136_v17 = vpop.f32.mrf.mxu0 }
 0x15f   :  { %v137_v18 = vadd.f32 %v348_v16, %v136_v17 }
 0x160   :  { %v377_v19 = vpop.f32.mrf.mxu0 }
 0x161   :  { %v142_v20 = vmax.f32 %v137_v18, 0.0 }
 0x162   :  { %v139_v21 = vpop.f32.mrf.mxu0 }
 0x163   :  { %v143_v22 = vpack.c.bf16 %v142_v20, %v142_v20 }
 0x164   :  { %v378_v23 = vpop.f32.mrf.mxu0 }
 0x165   :  { %396 = vmatmul.mubr.bf16.vlgmr.msra.gmra.mxu1 %v143_v22 }
 0x225   :  { %v249_v25 = vpop.f32.mrf.mxu1 }
 0x226   :  { %v250_v26 = vadd.f32 %v351_v24, %v249_v25 }
 0x227   :  { %v397_v28 = vpop.f32.mrf.mxu1 }
 0x228   :  { %v255_v29 = vmax.f32 %v250_v26, 0.0 }
 0x229   :  { %v252_v30 = vpop.f32.mrf.mxu1 }
 0x22a   :  { %400 = vmatpush3.xpose.msra.mxu0 %v255_v29 }
 0x22b   :  { %v398_v32 = vpop.f32.mrf.mxu1 }
 0x22d   :  { %402 = vmatmul.mubr.f32.vlgmr.msra.gmra.mxu0 %v257_v31 }
 0x2ed   :  { %v326_v34 = vpop.f32.mrf.mxu0 }
 0x2ee   :  { %v327_v35 = vadd.f32 %v326_v34, %v259_v33 }
 0x2ef   :  { %v403_v36 = vpop.f32.mrf.mxu0 }
 0x2f0   :  { %331 = vst.msk [vmem:[#allocation9] sm:$0x1] %vm330_vm4, %v327_v35 }
 0x2f1   :  { %493 = shalt.err (!%p490_p5)
}
 0x2f2   :  { %341 = dma.vmem_to_hbm [thread:$0]  %s339_s29, 16, %s600_s8, [#allocation5]  }
 0x2f3   :  { %506 = dma.done.wait [#allocation5], 16  }
 0x2f4   :  { %507 = vsyncadd [#allocation5], 4294967280 }
 0x2f5   :  { %345 = vsyncpa [#allocation4], 1 }
 0x2f6   :  { %346 = vsyncpa [#allocation7], 1 }
 0x2f7   :  { %347 = vsyncpa [#allocation5], 1 }

</bundles_post_ra>
